<compile_context>
chip_gen: v6e
topology: v6e:2x2x1
jax: 0.10.0
libtpu: 0.0.40
codegen_flags: <defaults>
</compile_context>

<pallas_src>
import functools

import jax
import jax.numpy as jnp
from jax import lax
from jax.experimental import pallas as pl
from jax.experimental.pallas import tpu as pltpu


def _lowest(dtype):
    """Identity element of max for the given dtype (dtype-aware, not -inf only)."""
    dtype = jnp.dtype(dtype)
    if jnp.issubdtype(dtype, jnp.floating):
        return float("-inf")
    return int(jnp.iinfo(dtype).min)


def _separable_window_max(x, oh, ow, kernel_size, stride):
    """x: (BC, Hp, Wp) value (already padded). Returns (BC, OH, OW) window max.

    Pass 1 reduces over kw along the lane (W) axis at stride 1; the W stride is
    applied once afterwards (a single strided relayout instead of k of them).
    Pass 2 reduces over kh along the sublane (H) axis.  The major (plane) axis
    is never touched, so out-of-range planes in a partial last block cannot
    corrupt valid planes.
    """
    bc, hp, wp = x.shape
    wc = wp - kernel_size + 1
    cols = None
    for kw in range(kernel_size):
        v = lax.slice_in_dim(x, kw, kw + wc, axis=2)          # (BC, Hp, Wc)
        cols = v if cols is None else jnp.maximum(cols, v)
    if stride > 1:
        cols = lax.slice(cols, (0, 0, 0),
                         (bc, hp, (ow - 1) * stride + 1),
                         (1, 1, stride))                       # (BC, Hp, OW)
    out = None
    for kh in range(kernel_size):
        v = lax.slice(cols, (0, kh, 0),
                      (bc, kh + (oh - 1) * stride + 1, ow),
                      (1, stride, 1))                          # (BC, OH, OW)
        out = v if out is None else jnp.maximum(out, v)
    return out


def _maxpool_kernel(x_ref, o_ref, *, kernel_size, stride):
    oh, ow = o_ref.shape[1], o_ref.shape[2]
    o_ref[...] = _separable_window_max(x_ref[...], oh, ow, kernel_size, stride)


def _maxpool_padded_kernel(x_ref, o_ref, xp_ref, *, kernel_size, stride,
                           padding, pad_val):
    bc, h, w = x_ref.shape
    _, hp, wp = xp_ref.shape
    dt = xp_ref.dtype
    # Fill only the border strips with the max-identity, then place the block
    # interior.  No extra HBM pass for padding; x is read from HBM once.
    xp_ref[:, 0:padding, :] = jnp.full((bc, padding, wp), pad_val, dt)
    xp_ref[:, padding + h:hp, :] = jnp.full((bc, hp - padding - h, wp), pad_val, dt)
    xp_ref[:, padding:padding + h, 0:padding] = jnp.full((bc, h, padding), pad_val, dt)
    xp_ref[:, padding:padding + h, padding + w:wp] = jnp.full(
        (bc, h, wp - padding - w), pad_val, dt)
    xp_ref[:, padding:padding + h, padding:padding + w] = x_ref[...]
    oh, ow = o_ref.shape[1], o_ref.shape[2]
    o_ref[...] = _separable_window_max(xp_ref[...], oh, ow, kernel_size, stride)


def _vmem_budget_and_limit():
    """Generation-aware VMEM working-set budget and Mosaic VMEM limit."""
    cap = 64 << 20                         # conservative default (v7x: 64 MiB/TC)
    try:
        info = pltpu.get_tpu_info()
        cap = int(getattr(info, "vmem_capacity_bytes", cap) or cap)
    except Exception:
        pass
    budget = (cap * 35) // 100             # ~22 MiB on v7x, ~45 MiB on v5e/v6e
    limit = (cap * 3) // 4                 # ~48 MiB on v7x, ~96 MiB on v5e/v6e
    return budget, limit


def _choose_planes_per_block(nc, h, w, hp, wp, oh, ow, itemsize, padding,
                             vmem_budget_bytes):
    """Planes per grid step, budgeted against VMEM (counts all intermediates)."""
    per_plane = itemsize * (
        2 * h * w                                  # double-buffered input block
        + 2 * oh * ow                              # double-buffered output block
        + (hp * wp if padding > 0 else 0)          # padded VMEM scratch
        + hp * wp                                  # `cols` intermediate (upper bound)
        + oh * ow                                  # kh slab temporary
    )
    bc = int(vmem_budget_bytes // max(1, per_plane))
    bc = max(1, min(nc, bc))
    # Keep >= 2 grid steps so the "parallel" axis can shard across v7x's two
    # TensorCores (negligible per-step overhead on single-TC v5e/v6e).
    if nc >= 2:
        bc = min(bc, pl.cdiv(nc, 2))
    # TODO(synk): add spatial (OH) tiling with halo for the case where even a
    # single plane exceeds the VMEM budget (huge H*W, tiny N*C).
    return bc


def max_pool_conv(x, kernel_size, stride=1, padding=0):
    """Equivalent of MaxPoolConv(kernel_size, stride, padding)(x) for NCHW x."""
    n, c, h, w = x.shape
    nc = n * c
    hp, wp = h + 2 * padding, w + 2 * padding
    oh = (hp - kernel_size) // stride + 1
    ow = (wp - kernel_size) // stride + 1
    pad_val = _lowest(x.dtype)

    budget, vmem_limit = _vmem_budget_and_limit()
    bc = _choose_planes_per_block(nc, h, w, hp, wp, oh, ow,
                                  jnp.dtype(x.dtype).itemsize, padding, budget)
    grid = (pl.cdiv(nc, bc),)

    if padding > 0:
        kernel = functools.partial(_maxpool_padded_kernel,
                                   kernel_size=kernel_size, stride=stride,
                                   padding=padding, pad_val=pad_val)
        scratch_shapes = [pltpu.VMEM((bc, hp, wp), x.dtype)]
    else:
        kernel = functools.partial(_maxpool_kernel,
                                   kernel_size=kernel_size, stride=stride)
        scratch_shapes = []

    # Natural (NC, H, W) view: reshape is layout-preserving (no relayout pass).
    xr = x.reshape(nc, h, w)

    # NOTE: if profiling still shows exposed DMA on 128-MiB chips (v5e/v6e),
    # pipeline_mode=pl.Buffered(3) on the input spec is the next lever; on v7x
    # the VMEM is better spent on a larger BC.
    out = pl.pallas_call(
        kernel,
        out_shape=jax.ShapeDtypeStruct((nc, oh, ow), x.dtype),
        grid_spec=pltpu.PrefetchScalarGridSpec(
            num_scalar_prefetch=0,
            grid=grid,
            in_specs=[pl.BlockSpec((bc, h, w), lambda i: (i, 0, 0))],
            out_specs=pl.BlockSpec((bc, oh, ow), lambda i: (i, 0, 0)),
            scratch_shapes=scratch_shapes,
        ),
        compiler_params=pltpu.CompilerParams(
            dimension_semantics=("parallel",),
            vmem_limit_bytes=vmem_limit,
        ),
    )(xr)

    return out.reshape(n, c, oh, ow)


def _reference_maxpool(x, kernel_size, stride=1, padding=0):
    # Pure-JAX reference via reduce_window (NCHW), MaxPool2d semantics.
    init = _lowest(x.dtype)
    if padding > 0:
        x = jnp.pad(
            x,
            ((0, 0), (0, 0), (padding, padding), (padding, padding)),
            constant_values=init,
        )
    return lax.reduce_window(
        x,
        jnp.array(init, x.dtype),
        lax.max,
        window_dimensions=(1, 1, kernel_size, kernel_size),
        window_strides=(1, 1, stride, stride),
        padding="VALID",
    )


if __name__ == "__main__":
    key = jax.random.PRNGKey(0)
    # Small NCHW input consistent with the module: batch=2, channels=4, 16x16.
    x = jax.random.normal(key, (2, 4, 16, 16), dtype=jnp.float32)

    # Module defaults (stride=1, padding=0), plus a padded configuration to
    # exercise the in-kernel padding path.
    for ks, st, pd in [(2, 1, 0), (3, 1, 1)]:
        out = jax.block_until_ready(max_pool_conv(x, ks, st, pd))
        ref = _reference_maxpool(x, ks, st, pd)
        assert out.shape == ref.shape, (out.shape, ref.shape)
        assert jnp.allclose(out, ref), f"mismatch for ks={ks}, st={st}, pd={pd}"

    print("KERNEL_OK")
</pallas_src>

<mosaic_0001>
module attributes {stable_mosaic.version = 11 : i64} {
  func.func @_maxpool_kernel(%arg0: i32, %arg1: memref<4x16x16xf32, #tpu.memory_space<vmem>>, %arg2: memref<4x15x15xf32, #tpu.memory_space<vmem>>) attributes {dimension_semantics = [#tpu.dimension_semantics<parallel>], iteration_bounds = array<i64: 2>, scalar_prefetch = 0 : i64, scratch_operands = 0 : i64, tpu.core_type = #tpu.core_type<tc>, window_params = [{transform_indices = @transform_0, window_bounds = array<i64: 4, 16, 16>}, {transform_indices = @transform_1, window_bounds = array<i64: 4, 15, 15>}]} {
    %c0 = arith.constant 0 : index
    %c0_0 = arith.constant 0 : index
    %c0_1 = arith.constant 0 : index
    %0 = vector.load %arg1[%c0, %c0_0, %c0_1] : memref<4x16x16xf32, #tpu.memory_space<vmem>>, vector<4x16x16xf32>
    %1 = vector.extract_strided_slice %0 {offsets = [0, 0, 0], sizes = [4, 16, 15], strides = [1, 1, 1]} : vector<4x16x16xf32> to vector<4x16x15xf32>
    %2 = vector.extract_strided_slice %0 {offsets = [0, 0, 1], sizes = [4, 16, 15], strides = [1, 1, 1]} : vector<4x16x16xf32> to vector<4x16x15xf32>
    %3 = arith.maximumf %1, %2 : vector<4x16x15xf32>
    %4 = vector.extract_strided_slice %3 {offsets = [0, 0, 0], sizes = [4, 15, 15], strides = [1, 1, 1]} : vector<4x16x15xf32> to vector<4x15x15xf32>
    %5 = vector.extract_strided_slice %3 {offsets = [0, 1, 0], sizes = [4, 15, 15], strides = [1, 1, 1]} : vector<4x16x15xf32> to vector<4x15x15xf32>
    %6 = arith.maximumf %4, %5 : vector<4x15x15xf32>
    %c0_2 = arith.constant 0 : index
    %c0_3 = arith.constant 0 : index
    %c0_4 = arith.constant 0 : index
    %7 = vector.load %arg2[%c0_2, %c0_3, %c0_4] : memref<4x15x15xf32, #tpu.memory_space<vmem>>, vector<4x15x15xf32>
    tpu.vector_store %arg2[%c0_2, %c0_3, %c0_4], %6 {strides = array<i32>} : memref<4x15x15xf32, #tpu.memory_space<vmem>>, vector<4x15x15xf32>,
    return
  }
  func.func @transform_0(%arg0: i32) -> (i32, i32, i32) {
    %c0_i32 = arith.constant 0 : i32
    %c0_i32_0 = arith.constant 0 : i32
    %c0_i32_1 = arith.constant 0 : i32
    return %arg0, %c0_i32, %c0_i32_0 : i32, i32, i32
  }
  func.func @transform_1(%arg0: i32) -> (i32, i32, i32) {
    %c0_i32 = arith.constant 0 : i32
    %c0_i32_0 = arith.constant 0 : i32
    %c0_i32_1 = arith.constant 0 : i32
    return %arg0, %c0_i32, %c0_i32_0 : i32, i32, i32
  }
}

</mosaic_0001>

<bundles_post_ra>
// kernel: tpu_custom_call.1
= control target key start
LH: loop header
LB: loop body
LE: loop exit
PB: predicated region body
PF: predicated region fallthrough
CT: control target
= control target key end

     0   :  { %6 = vsyncpa [#allocation3], 0  ;;  %s566_s0 = inlined_call_operand.hbm [shape: f32[8,16,16], index: 0, kind: input, shape index: {}]   ;;  %s567_s1 = inlined_call_operand.vmem [shape: f32[8,15,15], index: 1, kind: output, shape index: {}]  }
   0x1   :  { %8 = vsyncpa [#allocation3 + $0x1], 0  ;;  %s444_s6 = smov 0   ;;  %s446_s7 = smov 0  }
   0x2   :  { %s448_s8 = smov 0   ;;  %s450_s9 = smov 0  }
   0x3 LB: > { %s306_s10 = sadd.s32 4294967295, %s428_s9   ;;  %s464_s11 = sadd.s32 1, %s428_s9   ;;  %s428_s9 = sphi %s450_s9, %s576_s9   ;;  %s424_s8 = sphi %s448_s8, %s575_s8   ;;  %s420_s7 = sphi %s446_s7, %s574_s7   ;;  %s416_s6 = sphi %s444_s6, %s573_s6  }
   0x4   : > { %s18_s12 = ssub.s32 %s428_s9, %s464_s11  ;;  %s21_s13 = sadd.s32 1, %s424_s8 }
   0x5   : > { %p19_p0 = scmp.eq.s32.totalorder %s18_s12, 0  ;;  %p28_p1 = scmp.ne.s32.totalorder %s424_s8, %s420_s7 }
   0x6   : > { %p29_p2 = scmp.eq.s32.totalorder %s428_s9, 0  ;;  %p34_p3 = scmp.ne.s32.totalorder %s420_s7, %s416_s6 }
   0x7   : > { %s474_s14 = scalar_select %p19_p0, %s424_s8, %s21_s13  }
   0x8   : > { %p30_p4 = por %p29_p2, %p28_p1  ;;  %p35_p5 = scmp.eq.s32.totalorder %s306_s10, 0 }
   0x9   : > { %p330_p6 = scmp.lt.s32.totalorder %s428_s9, 2  ;;  %s84_s16 = sand.u32 1, %s424_s8  }
   0xa   : > { %p479_p7 = por %p35_p5, %p34_p3  ;;  %s310_s17 = sshll.u32 %s84_s16, 6 }
   0xb   : > { %s322_s18 = sshll.u32 %s428_s9, 10  ;;  %s88_s22 = scalar_lea.vmem [#allocation2], %s310_s17 }
   0xc   : > { %s569_s15 = scalar_select %p479_p7, 1, 0 }
   0xd   : > { %s488_s21 = scalar_lea.hbm %s566_s0, %s322_s18  ;;  %s96_s23 = sshll.u32 %s88_s22, 4  ;;  %s490_s23 = int_to_ptr.vmem [resolvable:$true] %s96_s23 }
   0xe   : > { %p492_p8 = pnand %p330_p6, %p30_p4  ;;  %s497_s25 = scalar_lea.sflag [#allocation3], %s84_s16 }
   0xf   : > { %s366_s26 = scalar_lea.hbm %s488_s21, 1024  ;;  %s371_s29 = scalar_lea.hbm %s566_s0, 2048 }
  0x10   : > { %p367_p10 = scmp.ne.s32.totalorder %s488_s21, %s366_s26  ;;  %p368_p11 = pneg %p492_p8 }
  0x11   : > { %p372_p0 = scmp.lt.s32.totalorder %s488_s21, %s566_s0  ;;  %p373_p1 = scmp.lt.s32.totalorder %s371_s29, %s366_s26 }
  0x12   : > { %p369_p12 = pnand %p368_p11, %p367_p10 }
  0x13   : > { %p374_p2 = por %p373_p1, %p372_p0 }
  0x14   : > { %p370_p13 = pneg %p369_p12 }
  0x16   : > { %p375_p3 = pnand %p374_p2, %p370_p13 }
  0x18   : > { %378 = shalt.err (!%p375_p3)
}
  0x19   : > { %s379_s3 = scalar_lea.vmem %s490_s23, 1024  ;;  %s430_s4 = smov [#allocation2]  }
  0x1a   : > { %p380_p4 = scmp.ne.s32.totalorder %s490_s23, %s379_s3  ;;  %s384_s5 = sshll.u32 %s430_s4, 4  ;;  %s385_s5 = int_to_ptr.vmem [resolvable:$false] %s384_s5 }
  0x1b   : > { %s386_s6 = scalar_lea.vmem %s385_s5, 2048  ;;  %p387_p10 = scmp.lt.s32.totalorder %s490_s23, %s385_s5 }
  0x1c   : > { %p382_p5 = pnand %p380_p4, %p368_p11  ;;  %p388_p12 = scmp.lt.s32.totalorder %s386_s6, %s379_s3 }
  0x1e   : > { %p383_p6 = pneg %p382_p5  ;;  %p389_p9 = por %p388_p12, %p387_p10 }
  0x20   : > { %p390_p7 = pnand %p389_p9, %p383_p6 }
  0x22   : > { %393 = shalt.err (!%p390_p7)
}
  0x23   : > { %s431_s12 = smov 128   ;;  %s432_s13 = smov 8  }
  0x24   : > { %329 = dma.hbm_to_vmem [thread:$0]  (!%p492_p8), %s488_s21, 1024, %s490_s23, %s497_s25, %s431_s12, %s431_s12, %s432_s13  }
  0x25   : > { %p104_p11 = scmp.lt.s32.totalorder %s428_s9, 3  ;;  %p571_p13 = scmp.ge.s32.totalorder %s428_s9, 1 }
  0x27   : > { %p105_p0 = pnand %p571_p13, %p104_p11 }
  0x28   : > { %s110_s16 = sand.u32 (!%p105_p0), 1, %s420_s7   ;;  %p572_p7 = scmp.ne.s32.totalorder (!%p105_p0), %s569_s15, 0 }
  0x29   : > { %108 = sbr.rel (%p105_p0) target bundleno = 183 (0xb7), region = 24  ;;  %s315_s17 = sshll.u32 (!%p105_p0), %s110_s16, 6 }
  0x2a   : > { %s111_s18 = scalar_lea.sflag (!%p105_p0), [#allocation3], %s110_s16  ;;  %s114_s19 = scalar_lea.vmem (!%p105_p0), [#allocation2], %s315_s17 }
  0x2e   : > { %411 = dma.done.wait (%p572_p7), %s111_s18, 1024  }
  0x2f   : > { %413 = vsyncadd (%p572_p7), %s111_s18, 4294966272  ;;  %v144_v0 = vld [vmem:[%s114_s19 + $0x10] sm:$0xff]  ;;  %v142_v1 = vld [vmem:[%s114_s19] sm:$0xff]  ;;  %s433_s20 = smov 127   ;;  %s316_s15 = sshll.u32 %s306_s10, 2  ;;  %vm198_vm0 = vcmask 1046528  }
  0x30   : > { %162 = vrot.lane.b32.xlu1 %v144_v0, %s433_s20  ;;  %158 = vrot.lane.b32.xlu0 %v142_v1, %s433_s20  ;;  %v145_v2 = vld [vmem:[%s114_s19 + $0x18] sm:$0xff]  ;;  %v143_v3 = vld [vmem:[%s114_s19 + $0x8] sm:$0xff]  ;;  %p136_p8 = scmp.lt.s32.totalorder %s316_s15, 7  ;;  %vm227_vm1 = vcmask 121856   ;;  %vm229_vm2 = vcmask 120832  }
  0x31   : > { %v147_v4 = vld [vmem:[%s114_s19 + $0x28] sm:$0xff]  ;;  %v146_v5 = vld [vmem:[%s114_s19 + $0x20] sm:$0xff]  ;;  %v149_v6 = vld [vmem:[%s114_s19 + $0x38] sm:$0xff] }
  0x32   : > { %v148_v7 = vld [vmem:[%s114_s19 + $0x30] sm:$0xff]  ;;  %s578_s15 = smov (!%p136_p8, %s316_s15), 7 }
  0x33   : > { %s323_s21 = sshll.u32 %s578_s15, 4 }
  0x34   : > { %164 = vrot.lane.b32.xlu1 %v145_v2, %s433_s20  ;;  %160 = vrot.lane.b32.xlu0 %v143_v3, %s433_s20  ;;  %s531_s9 = scalar_lea.vmem %s567_s1, %s323_s21 }
  0x38   : > { %168 = vrot.lane.b32.xlu1 %v147_v4, %s433_s20  ;;  %166 = vrot.lane.b32.xlu0 %v146_v5, %s433_s20 }
  0x3c   : > { %172 = vrot.lane.b32.xlu1 %v149_v6, %s433_s20  ;;  %170 = vrot.lane.b32.xlu0 %v148_v7, %s433_s20 }
  0xa2   : > { %v163_v8 = vpop.permute.xlu1 %162  ;;  %v159_v9 = vpop.permute.xlu0 %158 }
  0xa3   : > { %v184_v10 = vmax.f32 %v144_v0, %v163_v8  ;;  %v182_v11 = vmax.f32 %v142_v1, %v159_v9 }
  0xa5   : > { %v202_v16 = vrot.slane %v184_v10, 1  ;;  %v199_v17 = vrot.slane %v182_v11, 1 }
  0xa6   : > { %v165_v12 = vpop.permute.xlu1 %164  ;;  %v161_v13 = vpop.permute.xlu0 %160 }
  0xa7   : > { %v185_v14 = vmax.f32 %v145_v2, %v165_v12  ;;  %v183_v15 = vmax.f32 %v143_v3, %v161_v13 }
  0xa9   : > { %v203_v18 = vrot.slane %v185_v14, 1  ;;  %v200_v19 = vrot.slane %v183_v15, 1 }
  0xaa   : > { %v169_v20 = vpop.permute.xlu1 %168  ;;  %v167_v21 = vpop.permute.xlu0 %166 }
  0xab   : > { %v204_v22 = vsel %vm198_vm0, %v202_v16, %v203_v18  ;;  %v222_v23 = vmax.f32 %v185_v14, %v203_v18  ;;  %v201_v24 = vsel %vm198_vm0, %v199_v17, %v200_v19  ;;  %v220_v25 = vmax.f32 %v183_v15, %v200_v19 }
  0xac   : > { %v221_v26 = vmax.f32 %v184_v10, %v204_v22  ;;  %v219_v27 = vmax.f32 %v182_v11, %v201_v24  ;;  %v187_v28 = vmax.f32 %v147_v4, %v169_v20  ;;  %v186_v29 = vmax.f32 %v146_v5, %v167_v21 }
  0xad   : > { %230 = vst.msk [vmem:[%s531_s9 + $0x8] sm:$0x7f] %vm229_vm2, %v220_v25  ;;  %232 = vst.msk [vmem:[%s531_s9 + $0x18] sm:$0x7f] %vm229_vm2, %v222_v23 }
  0xae   : > { %228 = vst.msk [vmem:[%s531_s9] sm:$0xff] %vm227_vm1, %v219_v27  ;;  %v206_v30 = vrot.slane %v187_v28, 1  ;;  %v205_v31 = vrot.slane %v186_v29, 1  ;;  %v173_v32 = vpop.permute.xlu1 %172  ;;  %v171_v33 = vpop.permute.xlu0 %170  ;;  %231 = vst.msk [vmem:[%s531_s9 + $0x10] sm:$0xff] %vm227_vm1, %v221_v26 }
  0xaf   : > { %v189_v34 = vmax.f32 %v149_v6, %v173_v32  ;;  %v188_v35 = vmax.f32 %v148_v7, %v171_v33 }
  0xb0   : > { %v224_v36 = vmax.f32 %v187_v28, %v206_v30  ;;  %v207_v37 = vsel %vm198_vm0, %v205_v31, %v206_v30 }
  0xb1   : > { %v223_v38 = vmax.f32 %v186_v29, %v207_v37  ;;  %v209_v39 = vrot.slane %v189_v34, 1  ;;  %v208_v40 = vrot.slane %v188_v35, 1 }
  0xb2   : > { %234 = vst.msk [vmem:[%s531_s9 + $0x28] sm:$0x7f] %vm229_vm2, %v224_v36 }
  0xb3   : > { %233 = vst.msk [vmem:[%s531_s9 + $0x20] sm:$0xff] %vm227_vm1, %v223_v38  ;;  %v226_v41 = vmax.f32 %v189_v34, %v209_v39  ;;  %v210_v42 = vsel %vm198_vm0, %v208_v40, %v209_v39 }
  0xb4   : > { %v225_v43 = vmax.f32 %v188_v35, %v210_v42 }
  0xb5   : > { %236 = vst.msk [vmem:[%s531_s9 + $0x38] sm:$0x7f] %vm229_vm2, %v226_v41 }
  0xb6   : > { %235 = vst.msk [vmem:[%s531_s9 + $0x30] sm:$0xff] %vm227_vm1, %v225_v43 }
  0xb7 PF: > { %p11_p9 = scmp.ge.s32.totalorder %s464_s11, 4   ;;  %s573_s6 = smov %s420_s7 }
  0xb8   : > { %s574_s7 = smov %s424_s8  ;;  %s575_s8 = smov %s474_s14 }
  0xb9   : > { %s576_s9 = smov %s464_s11  ;;  %13 = sbr.rel (!%p11_p9) target bundleno = 3 (0x3), region = 64 }
  0xbe   :  { %261 = vsyncpa [#allocation3], 1 }
  0xbf   :  { %263 = vsyncpa [#allocation3 + $0x1], 1 }

</bundles_post_ra>
